<compile_context>
chip_gen: v7x
topology: tpu7x:2x2x1
jax: 0.10.0
libtpu: 0.0.40
codegen_flags: <defaults>
</compile_context>

<pallas_src>
import functools

import jax
import jax.numpy as jnp
from jax.experimental import pallas as pl
from jax.experimental.pallas import tpu as pltpu

BETA = 0.9                       # fixed discount factor of the Roy model
_SQRT2 = 1.4142135623730951


def _round_up(x, m):
    return ((x + m - 1) // m) * m


# ----------------------------------------------------------------------------
# Shared elementwise math (used by both the kernel and the pure-JAX reference)
# ----------------------------------------------------------------------------
def _ndtri(p):
    """Inverse standard-normal CDF via a single-branch-pair erfinv (Giles 2010).

    Only one log and one sqrt per element (EUP); the two 8th-order polynomials
    run on the VPU.  Clipping bounds |z| at ~4.75 for extreme draws.
    """
    p = jnp.clip(p, 1e-6, 1.0 - 1e-6)
    x = 2.0 * p - 1.0
    w = -jnp.log((1.0 - x) * (1.0 + x))

    # central branch (w < 5)
    wc = w - 2.5
    pc = 2.81022636e-08
    for cf in (3.43273939e-07, -3.5233877e-06, -4.39150654e-06, 0.00021858087,
               -0.00125372503, -0.00417768164, 0.246640727, 1.50140941):
        pc = cf + pc * wc

    # tail branch (w >= 5)
    wt = jnp.sqrt(w) - 3.0
    pt = -0.000200214257
    for cf in (0.000100950558, 0.00134934322, -0.00367342844, 0.00573950773,
               -0.0076224613, 0.00943887047, 1.00167406, 2.83297682):
        pt = cf + pt * wt

    return _SQRT2 * x * jnp.where(w < 5.0, pc, pt)


def _choice_kernel(diff, lambda_):
    """Sector-choice indicator inside the kernel (logistic-smoothed if lambda_>0)."""
    if lambda_ > 0:
        # fold 1/lambda into a static constant; no true divide (approx recip on EUP)
        return pl.reciprocal(1.0 + jnp.exp(diff * (-1.0 / float(lambda_))), approx=True)
    return jnp.where(diff >= 0.0, 1.0, 0.0)


def _choice_ref(diff, lambda_):
    if lambda_ > 0:
        return jax.nn.sigmoid(diff / lambda_)
    return jnp.where(diff >= 0.0, 1.0, 0.0)


# ----------------------------------------------------------------------------
# Parameter "glue" (O(1) scalar setup, stays in plain JAX)
# ----------------------------------------------------------------------------
def _shock_cov(s1, s2, rho_s, rho_t):
    z = 0.0 * s1
    return jnp.stack([
        jnp.stack([s1 * s1, rho_s * s1 * s2, rho_t * s1 * s1, z]),
        jnp.stack([rho_s * s1 * s2, s2 * s2, z, rho_t * s2 * s2]),
        jnp.stack([rho_t * s1 * s1, z, s1 * s1, rho_s * s1 * s2]),
        jnp.stack([z, rho_t * s2 * s2, rho_s * s1 * s2, s2 * s2]),
    ])


def _emax(m1, m2, s1, s2, rho):
    """E[max(X1, X2)] for bivariate normal means m1, m2, sds s1, s2, corr rho."""
    th = jnp.sqrt(jnp.maximum(s1 * s1 + s2 * s2 - 2.0 * rho * s1 * s2, 1e-12))
    a = (m1 - m2) / th
    return (m1 * jax.scipy.stats.norm.cdf(a)
            + m2 * jax.scipy.stats.norm.cdf(-a)
            + th * jax.scipy.stats.norm.pdf(a))


def _pack_params(theta):
    """16 scalars for SMEM: wage/continuation consts + lower-tri Cholesky entries."""
    mu1, mu2, g1, g2, s1, s2, rho_s, rho_t = [theta[i] for i in range(8)]
    L = jnp.linalg.cholesky(_shock_cov(s1, s2, rho_s, rho_t))      # (4, 4) lower
    cont1 = BETA * _emax(mu1 + g1, mu2, s1, s2, rho_s)             # worked sector 1
    cont2 = BETA * _emax(mu1, mu2 + g2, s1, s2, rho_s)             # worked sector 2
    consts = jnp.stack([
        mu1, mu2, g1, g2, cont1, cont2,
        L[0, 0],
        L[1, 0], L[1, 1],
        L[2, 0], L[2, 1], L[2, 2],
        L[3, 0], L[3, 1], L[3, 2], L[3, 3],
    ]).astype(jnp.float32)
    return consts


# ----------------------------------------------------------------------------
# Pallas kernel
# ----------------------------------------------------------------------------
def _royinv_kernel(consts_ref, u_ref, out_ref, *, lambda_):
    # consts_ref (SMEM f32[16]):
    #   [0..5]  mu1, mu2, gamma1, gamma2, beta*Emax1, beta*Emax2
    #   [6..15] lower-triangular Cholesky factor entries (row-major)
    mu1 = consts_ref[0]
    mu2 = consts_ref[1]
    g1 = consts_ref[2]
    g2 = consts_ref[3]
    cont_diff = consts_ref[4] - consts_ref[5]          # cont1 - cont2
    l00 = consts_ref[6]
    l10 = consts_ref[7]
    l11 = consts_ref[8]
    l20 = consts_ref[9]
    l21 = consts_ref[10]
    l22 = consts_ref[11]
    l30 = consts_ref[12]
    l31 = consts_ref[13]
    l32 = consts_ref[14]
    l33 = consts_ref[15]

    # Component-planar layout: u_ref[k] is a dense (rb, 128) plane holding
    # uniform component k of 128*rb observations.
    z0 = _ndtri(u_ref[0])
    z1 = _ndtri(u_ref[1])
    z2 = _ndtri(u_ref[2])
    z3 = _ndtri(u_ref[3])

    # Cholesky mix: 10 scalar-coefficient multiply-adds on the VPU.
    e11 = l00 * z0
    e12 = l10 * z0 + l11 * z1
    e21 = l20 * z0 + l21 * z1 + l22 * z2
    e22 = l30 * z0 + l31 * z1 + l32 * z2 + l33 * z3

    # period-1 log wages and sector choice with option value
    logw11 = mu1 + e11
    logw12 = mu2 + e12
    d1 = _choice_kernel((logw11 - logw12) + cont_diff, lambda_)

    # period-2 log wages (experience premium in the sector worked at t=1)
    logw21 = (mu1 + e21) + g1 * d1
    logw22 = ((mu2 + g2) + e22) - g2 * d1
    d2 = _choice_kernel(logw21 - logw22, lambda_)

    # observed (smoothed) wages
    w1 = logw12 + d1 * (logw11 - logw12)
    w2 = logw22 + d2 * (logw21 - logw22)

    # four dense output planes -> unmasked vector stores
    out_ref[0] = w1
    out_ref[1] = w2
    out_ref[2] = d1
    out_ref[3] = d2


def royinv(noise, theta, lambda_=0.0, *, block_rows=128):
    """noise: (N, 4) uniforms, theta: (8,) params. Returns (N, 4) = [logw1, logw2, d1, d2]."""
    noise = jnp.asarray(noise, jnp.float32)
    n = noise.shape[0]
    consts = _pack_params(jnp.asarray(theta, jnp.float32))

    # Component-planar layout: one small (N,4)->(4,N) transpose pass, then free
    # row-major reshape into (4, rows, 128) dense planes.
    n_rows = -(-n // 128)
    # target >= 4 grid steps (>= 2 per v7x TensorCore) when possible, sublanes x8
    rb = max(8, min(block_rows, _round_up(-(-n_rows // 4), 8)))
    n_rows_pad = _round_up(n_rows, rb)

    u_t = noise.T                                        # (4, N)
    pad = n_rows_pad * 128 - n
    if pad:
        u_t = jnp.pad(u_t, ((0, 0), (0, pad)), constant_values=0.5)
    u3 = u_t.reshape(4, n_rows_pad, 128)

    kernel = functools.partial(_royinv_kernel, lambda_=float(lambda_))
    n_elems = n_rows_pad * 128
    out3 = pl.pallas_call(
        kernel,
        out_shape=jax.ShapeDtypeStruct((4, n_rows_pad, 128), jnp.float32),
        grid=(n_rows_pad // rb,),
        in_specs=[
            pl.BlockSpec(memory_space=pltpu.MemorySpace.SMEM),      # 16 scalar params
            pl.BlockSpec((4, rb, 128), lambda i: (0, i, 0)),        # uniform planes
        ],
        out_specs=pl.BlockSpec((4, rb, 128), lambda i: (0, i, 0)),
        compiler_params=pltpu.CompilerParams(
            dimension_semantics=("parallel",)),
        cost_estimate=pl.CostEstimate(
            # ~90 flops per ndtri (x4 components) + ~50 for mix/wages/choices
            flops=int(n_elems * (4 * 90 + 50)),
            # 2 transcendentals per ndtri (log, sqrt) x 4 components
            transcendentals=int(n_elems * 8),
            bytes_accessed=int(2 * 4 * n_elems * 4 + 16 * 4),
        ),
    )(consts, u3)

    out_t = out3.reshape(4, -1)
    if pad:
        out_t = out_t[:, :n]
    return out_t.T                                       # (N, 4)


# Pure-JAX reference (independent math path) for correctness checking.
def royinv_ref(noise, theta, lambda_=0.0):
    noise = jnp.asarray(noise, jnp.float32)
    theta = jnp.asarray(theta, jnp.float32)
    mu1, mu2, g1, g2, s1, s2, rho_s, rho_t = [theta[i] for i in range(8)]
    L = jnp.linalg.cholesky(_shock_cov(s1, s2, rho_s, rho_t))
    z = _ndtri(noise)                     # (N, 4)
    eps = z @ L.T                         # (N, 4)
    e11, e12, e21, e22 = eps[:, 0], eps[:, 1], eps[:, 2], eps[:, 3]
    cont1 = BETA * _emax(mu1 + g1, mu2, s1, s2, rho_s)
    cont2 = BETA * _emax(mu1, mu2 + g2, s1, s2, rho_s)
    logw11, logw12 = mu1 + e11, mu2 + e12
    d1 = _choice_ref((logw11 + cont1) - (logw12 + cont2), float(lambda_))
    logw21 = mu1 + g1 * d1 + e21
    logw22 = mu2 + g2 * (1.0 - d1) + e22
    d2 = _choice_ref(logw21 - logw22, float(lambda_))
    w1 = d1 * logw11 + (1.0 - d1) * logw12
    w2 = d2 * logw21 + (1.0 - d2) * logw22
    return jnp.stack([w1, w2, d1, d2], axis=1)


class Generator:
    """JAX/Pallas equivalent of the PyTorch Generator module."""

    def __init__(self, initial_guess, lambda_=0):
        self.theta = jnp.asarray(initial_guess, jnp.float32)   # nn.Parameter
        self.lambda_ = lambda_
        self._royinv = jax.jit(functools.partial(royinv, lambda_=float(lambda_)))

    def __call__(self, noise):
        return self._royinv(noise, self.theta)


if __name__ == "__main__":
    key = jax.random.PRNGKey(0)
    n = 4096
    noise = jax.random.uniform(key, (n, 4), jnp.float32, minval=1e-4, maxval=1.0 - 1e-4)

    # theta = (mu1, mu2, gamma1, gamma2, sigma1, sigma2, rho_s, rho_t)
    initial_guess = jnp.array([1.8, 2.0, 0.5, 0.0, 1.0, 1.0, 0.5, 0.3], jnp.float32)

    gen = Generator(initial_guess, lambda_=0)
    out = jax.block_until_ready(gen(noise))
    assert out.shape == (n, 4), out.shape
    assert bool(jnp.all(jnp.isfinite(out)))

    ref = royinv_ref(noise, gen.theta, gen.lambda_)
    # The hard (lambda_=0) sector-choice indicator can flip on knife-edge draws
    # under tiny rounding/reassociation differences, so compare by mismatch fraction.
    bad = float(jnp.mean((jnp.abs(out - ref) > 2e-2).astype(jnp.float32)))
    assert bad < 0.02, f"mismatch fraction vs reference: {bad}"

    # ragged N exercises the padding path
    n2 = 1000
    noise2 = jax.random.uniform(jax.random.PRNGKey(1), (n2, 4), jnp.float32,
                                minval=1e-4, maxval=1.0 - 1e-4)
    out2 = jax.block_until_ready(royinv(noise2, gen.theta, 0.0))
    ref2 = royinv_ref(noise2, gen.theta, 0.0)
    assert out2.shape == (n2, 4), out2.shape
    bad2 = float(jnp.mean((jnp.abs(out2 - ref2) > 2e-2).astype(jnp.float32)))
    assert bad2 < 0.02, f"mismatch fraction vs reference (ragged): {bad2}"

    # smoothed-choice path (lambda_ > 0) also runs through the kernel
    gen_s = Generator(initial_guess, lambda_=0.1)
    out_s = jax.block_until_ready(gen_s(noise))
    ref_s = royinv_ref(noise, gen_s.theta, gen_s.lambda_)
    bad_s = float(jnp.mean((jnp.abs(out_s - ref_s) > 2e-2).astype(jnp.float32)))
    assert bad_s < 0.02, f"mismatch fraction vs reference (smoothed): {bad_s}"

    print("KERNEL_OK")
</pallas_src>

<mosaic_0001>
module attributes {stable_mosaic.version = 11 : i64} {
  func.func @_royinv_kernel(%arg0: i32, %arg1: memref<16xf32, #tpu.memory_space<smem>>, %arg2: memref<4x8x128xf32, #tpu.memory_space<vmem>>, %arg3: memref<4x8x128xf32, #tpu.memory_space<vmem>>) attributes {dimension_semantics = [#tpu.dimension_semantics<parallel>], iteration_bounds = array<i64: 4>, scalar_prefetch = 0 : i64, scratch_operands = 0 : i64, tpu.core_type = #tpu.core_type<tc>, window_params = [{transform_indices = @transform_0, window_bounds = array<i64: 16>}, {transform_indices = @transform_1, window_bounds = array<i64: 4, 8, 128>}, {transform_indices = @transform_2, window_bounds = array<i64: 4, 8, 128>}]} {
    %c0 = arith.constant 0 : index
    %0 = memref.load %arg1[%c0] : memref<16xf32, #tpu.memory_space<smem>>
    %c1 = arith.constant 1 : index
    %1 = memref.load %arg1[%c1] : memref<16xf32, #tpu.memory_space<smem>>
    %c2 = arith.constant 2 : index
    %2 = memref.load %arg1[%c2] : memref<16xf32, #tpu.memory_space<smem>>
    %c3 = arith.constant 3 : index
    %3 = memref.load %arg1[%c3] : memref<16xf32, #tpu.memory_space<smem>>
    %c4 = arith.constant 4 : index
    %4 = memref.load %arg1[%c4] : memref<16xf32, #tpu.memory_space<smem>>
    %c5 = arith.constant 5 : index
    %5 = memref.load %arg1[%c5] : memref<16xf32, #tpu.memory_space<smem>>
    %6 = arith.subf %4, %5 : f32
    %c6 = arith.constant 6 : index
    %7 = memref.load %arg1[%c6] : memref<16xf32, #tpu.memory_space<smem>>
    %c7 = arith.constant 7 : index
    %8 = memref.load %arg1[%c7] : memref<16xf32, #tpu.memory_space<smem>>
    %c8 = arith.constant 8 : index
    %9 = memref.load %arg1[%c8] : memref<16xf32, #tpu.memory_space<smem>>
    %c9 = arith.constant 9 : index
    %10 = memref.load %arg1[%c9] : memref<16xf32, #tpu.memory_space<smem>>
    %c10 = arith.constant 10 : index
    %11 = memref.load %arg1[%c10] : memref<16xf32, #tpu.memory_space<smem>>
    %c11 = arith.constant 11 : index
    %12 = memref.load %arg1[%c11] : memref<16xf32, #tpu.memory_space<smem>>
    %c12 = arith.constant 12 : index
    %13 = memref.load %arg1[%c12] : memref<16xf32, #tpu.memory_space<smem>>
    %c13 = arith.constant 13 : index
    %14 = memref.load %arg1[%c13] : memref<16xf32, #tpu.memory_space<smem>>
    %c14 = arith.constant 14 : index
    %15 = memref.load %arg1[%c14] : memref<16xf32, #tpu.memory_space<smem>>
    %c15 = arith.constant 15 : index
    %16 = memref.load %arg1[%c15] : memref<16xf32, #tpu.memory_space<smem>>
    %c0_0 = arith.constant 0 : index
    %c0_1 = arith.constant 0 : index
    %c0_2 = arith.constant 0 : index
    %17 = vector.load %arg2[%c0_0, %c0_1, %c0_2] : memref<4x8x128xf32, #tpu.memory_space<vmem>>, vector<1x8x128xf32>
    %18 = vector.shape_cast %17 : vector<1x8x128xf32> to vector<8x128xf32>
    %cst = arith.constant 9.99999997E-7 : f32
    %cst_3 = arith.constant 0.999998986 : f32
    %19 = vector.broadcast %cst : f32 to vector<8x128xf32>
    %20 = arith.maximumf %19, %18 : vector<8x128xf32>
    %21 = vector.broadcast %cst_3 : f32 to vector<8x128xf32>
    %22 = arith.minimumf %21, %20 : vector<8x128xf32>
    %cst_4 = arith.constant 2.000000e+00 : f32
    %23 = vector.broadcast %cst_4 : f32 to vector<8x128xf32>
    %24 = arith.mulf %23, %22 : vector<8x128xf32>
    %cst_5 = arith.constant 1.000000e+00 : f32
    %25 = vector.broadcast %cst_5 : f32 to vector<8x128xf32>
    %26 = arith.subf %24, %25 : vector<8x128xf32>
    %cst_6 = arith.constant 1.000000e+00 : f32
    %27 = vector.broadcast %cst_6 : f32 to vector<8x128xf32>
    %28 = arith.subf %27, %26 : vector<8x128xf32>
    %cst_7 = arith.constant 1.000000e+00 : f32
    %29 = vector.broadcast %cst_7 : f32 to vector<8x128xf32>
    %30 = arith.addf %29, %26 : vector<8x128xf32>
    %31 = arith.mulf %28, %30 : vector<8x128xf32>
    %32 = math.log %31 : vector<8x128xf32>
    %cst_8 = arith.constant 0.000000e+00 : f32
    %33 = vector.broadcast %cst_8 : f32 to vector<8x128xf32>
    %34 = arith.subf %33, %32 : vector<8x128xf32>
    %cst_9 = arith.constant 2.500000e+00 : f32
    %35 = vector.broadcast %cst_9 : f32 to vector<8x128xf32>
    %36 = arith.subf %34, %35 : vector<8x128xf32>
    %cst_10 = arith.constant 2.81022636E-8 : f32
    %37 = vector.broadcast %cst_10 : f32 to vector<8x128xf32>
    %38 = arith.mulf %37, %36 : vector<8x128xf32>
    %cst_11 = arith.constant 3.43273939E-7 : f32
    %39 = vector.broadcast %cst_11 : f32 to vector<8x128xf32>
    %40 = arith.addf %39, %38 : vector<8x128xf32>
    %41 = arith.mulf %40, %36 : vector<8x128xf32>
    %cst_12 = arith.constant -3.5233877E-6 : f32
    %42 = vector.broadcast %cst_12 : f32 to vector<8x128xf32>
    %43 = arith.addf %42, %41 : vector<8x128xf32>
    %44 = arith.mulf %43, %36 : vector<8x128xf32>
    %cst_13 = arith.constant -4.39150654E-6 : f32
    %45 = vector.broadcast %cst_13 : f32 to vector<8x128xf32>
    %46 = arith.addf %45, %44 : vector<8x128xf32>
    %47 = arith.mulf %46, %36 : vector<8x128xf32>
    %cst_14 = arith.constant 2.1858087E-4 : f32
    %48 = vector.broadcast %cst_14 : f32 to vector<8x128xf32>
    %49 = arith.addf %48, %47 : vector<8x128xf32>
    %50 = arith.mulf %49, %36 : vector<8x128xf32>
    %cst_15 = arith.constant -0.00125372503 : f32
    %51 = vector.broadcast %cst_15 : f32 to vector<8x128xf32>
    %52 = arith.addf %51, %50 : vector<8x128xf32>
    %53 = arith.mulf %52, %36 : vector<8x128xf32>
    %cst_16 = arith.constant -0.00417768164 : f32
    %54 = vector.broadcast %cst_16 : f32 to vector<8x128xf32>
    %55 = arith.addf %54, %53 : vector<8x128xf32>
    %56 = arith.mulf %55, %36 : vector<8x128xf32>
    %cst_17 = arith.constant 0.246640727 : f32
    %57 = vector.broadcast %cst_17 : f32 to vector<8x128xf32>
    %58 = arith.addf %57, %56 : vector<8x128xf32>
    %59 = arith.mulf %58, %36 : vector<8x128xf32>
    %cst_18 = arith.constant 1.50140941 : f32
    %60 = vector.broadcast %cst_18 : f32 to vector<8x128xf32>
    %61 = arith.addf %60, %59 : vector<8x128xf32>
    %62 = math.sqrt %34 : vector<8x128xf32>
    %cst_19 = arith.constant 3.000000e+00 : f32
    %63 = vector.broadcast %cst_19 : f32 to vector<8x128xf32>
    %64 = arith.subf %62, %63 : vector<8x128xf32>
    %cst_20 = arith.constant -2.00214257E-4 : f32
    %65 = vector.broadcast %cst_20 : f32 to vector<8x128xf32>
    %66 = arith.mulf %65, %64 : vector<8x128xf32>
    %cst_21 = arith.constant 1.00950558E-4 : f32
    %67 = vector.broadcast %cst_21 : f32 to vector<8x128xf32>
    %68 = arith.addf %67, %66 : vector<8x128xf32>
    %69 = arith.mulf %68, %64 : vector<8x128xf32>
    %cst_22 = arith.constant 0.00134934322 : f32
    %70 = vector.broadcast %cst_22 : f32 to vector<8x128xf32>
    %71 = arith.addf %70, %69 : vector<8x128xf32>
    %72 = arith.mulf %71, %64 : vector<8x128xf32>
    %cst_23 = arith.constant -0.00367342844 : f32
    %73 = vector.broadcast %cst_23 : f32 to vector<8x128xf32>
    %74 = arith.addf %73, %72 : vector<8x128xf32>
    %75 = arith.mulf %74, %64 : vector<8x128xf32>
    %cst_24 = arith.constant 0.00573950773 : f32
    %76 = vector.broadcast %cst_24 : f32 to vector<8x128xf32>
    %77 = arith.addf %76, %75 : vector<8x128xf32>
    %78 = arith.mulf %77, %64 : vector<8x128xf32>
    %cst_25 = arith.constant -0.0076224613 : f32
    %79 = vector.broadcast %cst_25 : f32 to vector<8x128xf32>
    %80 = arith.addf %79, %78 : vector<8x128xf32>
    %81 = arith.mulf %80, %64 : vector<8x128xf32>
    %cst_26 = arith.constant 0.00943887047 : f32
    %82 = vector.broadcast %cst_26 : f32 to vector<8x128xf32>
    %83 = arith.addf %82, %81 : vector<8x128xf32>
    %84 = arith.mulf %83, %64 : vector<8x128xf32>
    %cst_27 = arith.constant 1.00167406 : f32
    %85 = vector.broadcast %cst_27 : f32 to vector<8x128xf32>
    %86 = arith.addf %85, %84 : vector<8x128xf32>
    %87 = arith.mulf %86, %64 : vector<8x128xf32>
    %cst_28 = arith.constant 2.83297682 : f32
    %88 = vector.broadcast %cst_28 : f32 to vector<8x128xf32>
    %89 = arith.addf %88, %87 : vector<8x128xf32>
    %cst_29 = arith.constant 1.41421354 : f32
    %90 = vector.broadcast %cst_29 : f32 to vector<8x128xf32>
    %91 = arith.mulf %90, %26 : vector<8x128xf32>
    %cst_30 = arith.constant 5.000000e+00 : f32
    %92 = vector.broadcast %cst_30 : f32 to vector<8x128xf32>
    %93 = arith.cmpf olt, %34, %92 : vector<8x128xf32>
    %94 = arith.select %93, %61, %89 : vector<8x128xi1>, vector<8x128xf32>
    %95 = arith.mulf %91, %94 : vector<8x128xf32>
    %c1_31 = arith.constant 1 : index
    %c0_32 = arith.constant 0 : index
    %c0_33 = arith.constant 0 : index
    %96 = vector.load %arg2[%c1_31, %c0_32, %c0_33] : memref<4x8x128xf32, #tpu.memory_space<vmem>>, vector<1x8x128xf32>
    %97 = vector.shape_cast %96 : vector<1x8x128xf32> to vector<8x128xf32>
    %cst_34 = arith.constant 9.99999997E-7 : f32
    %cst_35 = arith.constant 0.999998986 : f32
    %98 = vector.broadcast %cst_34 : f32 to vector<8x128xf32>
    %99 = arith.maximumf %98, %97 : vector<8x128xf32>
    %100 = vector.broadcast %cst_35 : f32 to vector<8x128xf32>
    %101 = arith.minimumf %100, %99 : vector<8x128xf32>
    %cst_36 = arith.constant 2.000000e+00 : f32
    %102 = vector.broadcast %cst_36 : f32 to vector<8x128xf32>
    %103 = arith.mulf %102, %101 : vector<8x128xf32>
    %cst_37 = arith.constant 1.000000e+00 : f32
    %104 = vector.broadcast %cst_37 : f32 to vector<8x128xf32>
    %105 = arith.subf %103, %104 : vector<8x128xf32>
    %cst_38 = arith.constant 1.000000e+00 : f32
    %106 = vector.broadcast %cst_38 : f32 to vector<8x128xf32>
    %107 = arith.subf %106, %105 : vector<8x128xf32>
    %cst_39 = arith.constant 1.000000e+00 : f32
    %108 = vector.broadcast %cst_39 : f32 to vector<8x128xf32>
    %109 = arith.addf %108, %105 : vector<8x128xf32>
    %110 = arith.mulf %107, %109 : vector<8x128xf32>
    %111 = math.log %110 : vector<8x128xf32>
    %cst_40 = arith.constant 0.000000e+00 : f32
    %112 = vector.broadcast %cst_40 : f32 to vector<8x128xf32>
    %113 = arith.subf %112, %111 : vector<8x128xf32>
    %cst_41 = arith.constant 2.500000e+00 : f32
    %114 = vector.broadcast %cst_41 : f32 to vector<8x128xf32>
    %115 = arith.subf %113, %114 : vector<8x128xf32>
    %cst_42 = arith.constant 2.81022636E-8 : f32
    %116 = vector.broadcast %cst_42 : f32 to vector<8x128xf32>
    %117 = arith.mulf %116, %115 : vector<8x128xf32>
    %cst_43 = arith.constant 3.43273939E-7 : f32
    %118 = vector.broadcast %cst_43 : f32 to vector<8x128xf32>
    %119 = arith.addf %118, %117 : vector<8x128xf32>
    %120 = arith.mulf %119, %115 : vector<8x128xf32>
    %cst_44 = arith.constant -3.5233877E-6 : f32
    %121 = vector.broadcast %cst_44 : f32 to vector<8x128xf32>
    %122 = arith.addf %121, %120 : vector<8x128xf32>
    %123 = arith.mulf %122, %115 : vector<8x128xf32>
    %cst_45 = arith.constant -4.39150654E-6 : f32
    %124 = vector.broadcast %cst_45 : f32 to vector<8x128xf32>
    %125 = arith.addf %124, %123 : vector<8x128xf32>
    %126 = arith.mulf %125, %115 : vector<8x128xf32>
    %cst_46 = arith.constant 2.1858087E-4 : f32
    %127 = vector.broadcast %cst_46 : f32 to vector<8x128xf32>
    %128 = arith.addf %127, %126 : vector<8x128xf32>
    %129 = arith.mulf %128, %115 : vector<8x128xf32>
    %cst_47 = arith.constant -0.00125372503 : f32
    %130 = vector.broadcast %cst_47 : f32 to vector<8x128xf32>
    %131 = arith.addf %130, %129 : vector<8x128xf32>
    %132 = arith.mulf %131, %115 : vector<8x128xf32>
    %cst_48 = arith.constant -0.00417768164 : f32
    %133 = vector.broadcast %cst_48 : f32 to vector<8x128xf32>
    %134 = arith.addf %133, %132 : vector<8x128xf32>
    %135 = arith.mulf %134, %115 : vector<8x128xf32>
    %cst_49 = arith.constant 0.246640727 : f32
    %136 = vector.broadcast %cst_49 : f32 to vector<8x128xf32>
    %137 = arith.addf %136, %135 : vector<8x128xf32>
    %138 = arith.mulf %137, %115 : vector<8x128xf32>
    %cst_50 = arith.constant 1.50140941 : f32
    %139 = vector.broadcast %cst_50 : f32 to vector<8x128xf32>
    %140 = arith.addf %139, %138 : vector<8x128xf32>
    %141 = math.sqrt %113 : vector<8x128xf32>
    %cst_51 = arith.constant 3.000000e+00 : f32
    %142 = vector.broadcast %cst_51 : f32 to vector<8x128xf32>
    %143 = arith.subf %141, %142 : vector<8x128xf32>
    %cst_52 = arith.constant -2.00214257E-4 : f32
    %144 = vector.broadcast %cst_52 : f32 to vector<8x128xf32>
    %145 = arith.mulf %144, %143 : vector<8x128xf32>
    %cst_53 = arith.constant 1.00950558E-4 : f32
    %146 = vector.broadcast %cst_53 : f32 to vector<8x128xf32>
    %147 = arith.addf %146, %145 : vector<8x128xf32>
    %148 = arith.mulf %147, %143 : vector<8x128xf32>
    %cst_54 = arith.constant 0.00134934322 : f32
    %149 = vector.broadcast %cst_54 : f32 to vector<8x128xf32>
    %150 = arith.addf %149, %148 : vector<8x128xf32>
    %151 = arith.mulf %150, %143 : vector<8x128xf32>
    %cst_55 = arith.constant -0.00367342844 : f32
    %152 = vector.broadcast %cst_55 : f32 to vector<8x128xf32>
    %153 = arith.addf %152, %151 : vector<8x128xf32>
    %154 = arith.mulf %153, %143 : vector<8x128xf32>
    %cst_56 = arith.constant 0.00573950773 : f32
    %155 = vector.broadcast %cst_56 : f32 to vector<8x128xf32>
    %156 = arith.addf %155, %154 : vector<8x128xf32>
    %157 = arith.mulf %156, %143 : vector<8x128xf32>
    %cst_57 = arith.constant -0.0076224613 : f32
    %158 = vector.broadcast %cst_57 : f32 to vector<8x128xf32>
    %159 = arith.addf %158, %157 : vector<8x128xf32>
    %160 = arith.mulf %159, %143 : vector<8x128xf32>
    %cst_58 = arith.constant 0.00943887047 : f32
    %161 = vector.broadcast %cst_58 : f32 to vector<8x128xf32>
    %162 = arith.addf %161, %160 : vector<8x128xf32>
    %163 = arith.mulf %162, %143 : vector<8x128xf32>
    %cst_59 = arith.constant 1.00167406 : f32
    %164 = vector.broadcast %cst_59 : f32 to vector<8x128xf32>
    %165 = arith.addf %164, %163 : vector<8x128xf32>
    %166 = arith.mulf %165, %143 : vector<8x128xf32>
    %cst_60 = arith.constant 2.83297682 : f32
    %167 = vector.broadcast %cst_60 : f32 to vector<8x128xf32>
    %168 = arith.addf %167, %166 : vector<8x128xf32>
    %cst_61 = arith.constant 1.41421354 : f32
    %169 = vector.broadcast %cst_61 : f32 to vector<8x128xf32>
    %170 = arith.mulf %169, %105 : vector<8x128xf32>
    %cst_62 = arith.constant 5.000000e+00 : f32
    %171 = vector.broadcast %cst_62 : f32 to vector<8x128xf32>
    %172 = arith.cmpf olt, %113, %171 : vector<8x128xf32>
    %173 = arith.select %172, %140, %168 : vector<8x128xi1>, vector<8x128xf32>
    %174 = arith.mulf %170, %173 : vector<8x128xf32>
    %c2_63 = arith.constant 2 : index
    %c0_64 = arith.constant 0 : index
    %c0_65 = arith.constant 0 : index
    %175 = vector.load %arg2[%c2_63, %c0_64, %c0_65] : memref<4x8x128xf32, #tpu.memory_space<vmem>>, vector<1x8x128xf32>
    %176 = vector.shape_cast %175 : vector<1x8x128xf32> to vector<8x128xf32>
    %cst_66 = arith.constant 9.99999997E-7 : f32
    %cst_67 = arith.constant 0.999998986 : f32
    %177 = vector.broadcast %cst_66 : f32 to vector<8x128xf32>
    %178 = arith.maximumf %177, %176 : vector<8x128xf32>
    %179 = vector.broadcast %cst_67 : f32 to vector<8x128xf32>
    %180 = arith.minimumf %179, %178 : vector<8x128xf32>
    %cst_68 = arith.constant 2.000000e+00 : f32
    %181 = vector.broadcast %cst_68 : f32 to vector<8x128xf32>
    %182 = arith.mulf %181, %180 : vector<8x128xf32>
    %cst_69 = arith.constant 1.000000e+00 : f32
    %183 = vector.broadcast %cst_69 : f32 to vector<8x128xf32>
    %184 = arith.subf %182, %183 : vector<8x128xf32>
    %cst_70 = arith.constant 1.000000e+00 : f32
    %185 = vector.broadcast %cst_70 : f32 to vector<8x128xf32>
    %186 = arith.subf %185, %184 : vector<8x128xf32>
    %cst_71 = arith.constant 1.000000e+00 : f32
    %187 = vector.broadcast %cst_71 : f32 to vector<8x128xf32>
    %188 = arith.addf %187, %184 : vector<8x128xf32>
    %189 = arith.mulf %186, %188 : vector<8x128xf32>
    %190 = math.log %189 : vector<8x128xf32>
    %cst_72 = arith.constant 0.000000e+00 : f32
    %191 = vector.broadcast %cst_72 : f32 to vector<8x128xf32>
    %192 = arith.subf %191, %190 : vector<8x128xf32>
    %cst_73 = arith.constant 2.500000e+00 : f32
    %193 = vector.broadcast %cst_73 : f32 to vector<8x128xf32>
    %194 = arith.subf %192, %193 : vector<8x128xf32>
    %cst_74 = arith.constant 2.81022636E-8 : f32
    %195 = vector.broadcast %cst_74 : f32 to vector<8x128xf32>
    %196 = arith.mulf %195, %194 : vector<8x128xf32>
    %cst_75 = arith.constant 3.43273939E-7 : f32
    %197 = vector.broadcast %cst_75 : f32 to vector<8x128xf32>
    %198 = arith.addf %197, %196 : vector<8x128xf32>
    %199 = arith.mulf %198, %194 : vector<8x128xf32>
    %cst_76 = arith.constant -3.5233877E-6 : f32
    %200 = vector.broadcast %cst_76 : f32 to vector<8x128xf32>
    %201 = arith.addf %200, %199 : vector<8x128xf32>
    %202 = arith.mulf %201, %194 : vector<8x128xf32>
    %cst_77 = arith.constant -4.39150654E-6 : f32
    %203 = vector.broadcast %cst_77 : f32 to vector<8x128xf32>
    %204 = arith.addf %203, %202 : vector<8x128xf32>
    %205 = arith.mulf %204, %194 : vector<8x128xf32>
    %cst_78 = arith.constant 2.1858087E-4 : f32
    %206 = vector.broadcast %cst_78 : f32 to vector<8x128xf32>
    %207 = arith.addf %206, %205 : vector<8x128xf32>
    %208 = arith.mulf %207, %194 : vector<8x128xf32>
    %cst_79 = arith.constant -0.00125372503 : f32
    %209 = vector.broadcast %cst_79 : f32 to vector<8x128xf32>
    %210 = arith.addf %209, %208 : vector<8x128xf32>
    %211 = arith.mulf %210, %194 : vector<8x128xf32>
    %cst_80 = arith.constant -0.00417768164 : f32
    %212 = vector.broadcast %cst_80 : f32 to vector<8x128xf32>
    %213 = arith.addf %212, %211 : vector<8x128xf32>
    %214 = arith.mulf %213, %194 : vector<8x128xf32>
    %cst_81 = arith.constant 0.246640727 : f32
    %215 = vector.broadcast %cst_81 : f32 to vector<8x128xf32>
    %216 = arith.addf %215, %214 : vector<8x128xf32>
    %217 = arith.mulf %216, %194 : vector<8x128xf32>
    %cst_82 = arith.constant 1.50140941 : f32
    %218 = vector.broadcast %cst_82 : f32 to vector<8x128xf32>
    %219 = arith.addf %218, %217 : vector<8x128xf32>
    %220 = math.sqrt %192 : vector<8x128xf32>
    %cst_83 = arith.constant 3.000000e+00 : f32
    %221 = vector.broadcast %cst_83 : f32 to vector<8x128xf32>
    %222 = arith.subf %220, %221 : vector<8x128xf32>
    %cst_84 = arith.constant -2.00214257E-4 : f32
    %223 = vector.broadcast %cst_84 : f32 to vector<8x128xf32>
    %224 = arith.mulf %223, %222 : vector<8x128xf32>
    %cst_85 = arith.constant 1.00950558E-4 : f32
    %225 = vector.broadcast %cst_85 : f32 to vector<8x128xf32>
    %226 = arith.addf %225, %224 : vector<8x128xf32>
    %227 = arith.mulf %226, %222 : vector<8x128xf32>
    %cst_86 = arith.constant 0.00134934322 : f32
    %228 = vector.broadcast %cst_86 : f32 to vector<8x128xf32>
    %229 = arith.addf %228, %227 : vector<8x128xf32>
    %230 = arith.mulf %229, %222 : vector<8x128xf32>
    %cst_87 = arith.constant -0.00367342844 : f32
    %231 = vector.broadcast %cst_87 : f32 to vector<8x128xf32>
    %232 = arith.addf %231, %230 : vector<8x128xf32>
    %233 = arith.mulf %232, %222 : vector<8x128xf32>
    %cst_88 = arith.constant 0.00573950773 : f32
    %234 = vector.broadcast %cst_88 : f32 to vector<8x128xf32>
    %235 = arith.addf %234, %233 : vector<8x128xf32>
    %236 = arith.mulf %235, %222 : vector<8x128xf32>
    %cst_89 = arith.constant -0.0076224613 : f32
    %237 = vector.broadcast %cst_89 : f32 to vector<8x128xf32>
    %238 = arith.addf %237, %236 : vector<8x128xf32>
    %239 = arith.mulf %238, %222 : vector<8x128xf32>
    %cst_90 = arith.constant 0.00943887047 : f32
    %240 = vector.broadcast %cst_90 : f32 to vector<8x128xf32>
    %241 = arith.addf %240, %239 : vector<8x128xf32>
    %242 = arith.mulf %241, %222 : vector<8x128xf32>
    %cst_91 = arith.constant 1.00167406 : f32
    %243 = vector.broadcast %cst_91 : f32 to vector<8x128xf32>
    %244 = arith.addf %243, %242 : vector<8x128xf32>
    %245 = arith.mulf %244, %222 : vector<8x128xf32>
    %cst_92 = arith.constant 2.83297682 : f32
    %246 = vector.broadcast %cst_92 : f32 to vector<8x128xf32>
    %247 = arith.addf %246, %245 : vector<8x128xf32>
    %cst_93 = arith.constant 1.41421354 : f32
    %248 = vector.broadcast %cst_93 : f32 to vector<8x128xf32>
    %249 = arith.mulf %248, %184 : vector<8x128xf32>
    %cst_94 = arith.constant 5.000000e+00 : f32
    %250 = vector.broadcast %cst_94 : f32 to vector<8x128xf32>
    %251 = arith.cmpf olt, %192, %250 : vector<8x128xf32>
    %252 = arith.select %251, %219, %247 : vector<8x128xi1>, vector<8x128xf32>
    %253 = arith.mulf %249, %252 : vector<8x128xf32>
    %c3_95 = arith.constant 3 : index
    %c0_96 = arith.constant 0 : index
    %c0_97 = arith.constant 0 : index
    %254 = vector.load %arg2[%c3_95, %c0_96, %c0_97] : memref<4x8x128xf32, #tpu.memory_space<vmem>>, vector<1x8x128xf32>
    %255 = vector.shape_cast %254 : vector<1x8x128xf32> to vector<8x128xf32>
    %cst_98 = arith.constant 9.99999997E-7 : f32
    %cst_99 = arith.constant 0.999998986 : f32
    %256 = vector.broadcast %cst_98 : f32 to vector<8x128xf32>
    %257 = arith.maximumf %256, %255 : vector<8x128xf32>
    %258 = vector.broadcast %cst_99 : f32 to vector<8x128xf32>
    %259 = arith.minimumf %258, %257 : vector<8x128xf32>
    %cst_100 = arith.constant 2.000000e+00 : f32
    %260 = vector.broadcast %cst_100 : f32 to vector<8x128xf32>
    %261 = arith.mulf %260, %259 : vector<8x128xf32>
    %cst_101 = arith.constant 1.000000e+00 : f32
    %262 = vector.broadcast %cst_101 : f32 to vector<8x128xf32>
    %263 = arith.subf %261, %262 : vector<8x128xf32>
    %cst_102 = arith.constant 1.000000e+00 : f32
    %264 = vector.broadcast %cst_102 : f32 to vector<8x128xf32>
    %265 = arith.subf %264, %263 : vector<8x128xf32>
    %cst_103 = arith.constant 1.000000e+00 : f32
    %266 = vector.broadcast %cst_103 : f32 to vector<8x128xf32>
    %267 = arith.addf %266, %263 : vector<8x128xf32>
    %268 = arith.mulf %265, %267 : vector<8x128xf32>
    %269 = math.log %268 : vector<8x128xf32>
    %cst_104 = arith.constant 0.000000e+00 : f32
    %270 = vector.broadcast %cst_104 : f32 to vector<8x128xf32>
    %271 = arith.subf %270, %269 : vector<8x128xf32>
    %cst_105 = arith.constant 2.500000e+00 : f32
    %272 = vector.broadcast %cst_105 : f32 to vector<8x128xf32>
    %273 = arith.subf %271, %272 : vector<8x128xf32>
    %cst_106 = arith.constant 2.81022636E-8 : f32
    %274 = vector.broadcast %cst_106 : f32 to vector<8x128xf32>
    %275 = arith.mulf %274, %273 : vector<8x128xf32>
    %cst_107 = arith.constant 3.43273939E-7 : f32
    %276 = vector.broadcast %cst_107 : f32 to vector<8x128xf32>
    %277 = arith.addf %276, %275 : vector<8x128xf32>
    %278 = arith.mulf %277, %273 : vector<8x128xf32>
    %cst_108 = arith.constant -3.5233877E-6 : f32
    %279 = vector.broadcast %cst_108 : f32 to vector<8x128xf32>
    %280 = arith.addf %279, %278 : vector<8x128xf32>
    %281 = arith.mulf %280, %273 : vector<8x128xf32>
    %cst_109 = arith.constant -4.39150654E-6 : f32
    %282 = vector.broadcast %cst_109 : f32 to vector<8x128xf32>
    %283 = arith.addf %282, %281 : vector<8x128xf32>
    %284 = arith.mulf %283, %273 : vector<8x128xf32>
    %cst_110 = arith.constant 2.1858087E-4 : f32
    %285 = vector.broadcast %cst_110 : f32 to vector<8x128xf32>
    %286 = arith.addf %285, %284 : vector<8x128xf32>
    %287 = arith.mulf %286, %273 : vector<8x128xf32>
    %cst_111 = arith.constant -0.00125372503 : f32
    %288 = vector.broadcast %cst_111 : f32 to vector<8x128xf32>
    %289 = arith.addf %288, %287 : vector<8x128xf32>
    %290 = arith.mulf %289, %273 : vector<8x128xf32>
    %cst_112 = arith.constant -0.00417768164 : f32
    %291 = vector.broadcast %cst_112 : f32 to vector<8x128xf32>
    %292 = arith.addf %291, %290 : vector<8x128xf32>
    %293 = arith.mulf %292, %273 : vector<8x128xf32>
    %cst_113 = arith.constant 0.246640727 : f32
    %294 = vector.broadcast %cst_113 : f32 to vector<8x128xf32>
    %295 = arith.addf %294, %293 : vector<8x128xf32>
    %296 = arith.mulf %295, %273 : vector<8x128xf32>
    %cst_114 = arith.constant 1.50140941 : f32
    %297 = vector.broadcast %cst_114 : f32 to vector<8x128xf32>
    %298 = arith.addf %297, %296 : vector<8x128xf32>
    %299 = math.sqrt %271 : vector<8x128xf32>
    %cst_115 = arith.constant 3.000000e+00 : f32
    %300 = vector.broadcast %cst_115 : f32 to vector<8x128xf32>
    %301 = arith.subf %299, %300 : vector<8x128xf32>
    %cst_116 = arith.constant -2.00214257E-4 : f32
    %302 = vector.broadcast %cst_116 : f32 to vector<8x128xf32>
    %303 = arith.mulf %302, %301 : vector<8x128xf32>
    %cst_117 = arith.constant 1.00950558E-4 : f32
    %304 = vector.broadcast %cst_117 : f32 to vector<8x128xf32>
    %305 = arith.addf %304, %303 : vector<8x128xf32>
    %306 = arith.mulf %305, %301 : vector<8x128xf32>
    %cst_118 = arith.constant 0.00134934322 : f32
    %307 = vector.broadcast %cst_118 : f32 to vector<8x128xf32>
    %308 = arith.addf %307, %306 : vector<8x128xf32>
    %309 = arith.mulf %308, %301 : vector<8x128xf32>
    %cst_119 = arith.constant -0.00367342844 : f32
    %310 = vector.broadcast %cst_119 : f32 to vector<8x128xf32>
    %311 = arith.addf %310, %309 : vector<8x128xf32>
    %312 = arith.mulf %311, %301 : vector<8x128xf32>
    %cst_120 = arith.constant 0.00573950773 : f32
    %313 = vector.broadcast %cst_120 : f32 to vector<8x128xf32>
    %314 = arith.addf %313, %312 : vector<8x128xf32>
    %315 = arith.mulf %314, %301 : vector<8x128xf32>
    %cst_121 = arith.constant -0.0076224613 : f32
    %316 = vector.broadcast %cst_121 : f32 to vector<8x128xf32>
    %317 = arith.addf %316, %315 : vector<8x128xf32>
    %318 = arith.mulf %317, %301 : vector<8x128xf32>
    %cst_122 = arith.constant 0.00943887047 : f32
    %319 = vector.broadcast %cst_122 : f32 to vector<8x128xf32>
    %320 = arith.addf %319, %318 : vector<8x128xf32>
    %321 = arith.mulf %320, %301 : vector<8x128xf32>
    %cst_123 = arith.constant 1.00167406 : f32
    %322 = vector.broadcast %cst_123 : f32 to vector<8x128xf32>
    %323 = arith.addf %322, %321 : vector<8x128xf32>
    %324 = arith.mulf %323, %301 : vector<8x128xf32>
    %cst_124 = arith.constant 2.83297682 : f32
    %325 = vector.broadcast %cst_124 : f32 to vector<8x128xf32>
    %326 = arith.addf %325, %324 : vector<8x128xf32>
    %cst_125 = arith.constant 1.41421354 : f32
    %327 = vector.broadcast %cst_125 : f32 to vector<8x128xf32>
    %328 = arith.mulf %327, %263 : vector<8x128xf32>
    %cst_126 = arith.constant 5.000000e+00 : f32
    %329 = vector.broadcast %cst_126 : f32 to vector<8x128xf32>
    %330 = arith.cmpf olt, %271, %329 : vector<8x128xf32>
    %331 = arith.select %330, %298, %326 : vector<8x128xi1>, vector<8x128xf32>
    %332 = arith.mulf %328, %331 : vector<8x128xf32>
    %333 = vector.broadcast %7 : f32 to vector<8x128xf32>
    %334 = arith.mulf %333, %95 : vector<8x128xf32>
    %335 = vector.broadcast %8 : f32 to vector<8x128xf32>
    %336 = arith.mulf %335, %95 : vector<8x128xf32>
    %337 = vector.broadcast %9 : f32 to vector<8x128xf32>
    %338 = arith.mulf %337, %174 : vector<8x128xf32>
    %339 = arith.addf %336, %338 : vector<8x128xf32>
    %340 = vector.broadcast %10 : f32 to vector<8x128xf32>
    %341 = arith.mulf %340, %95 : vector<8x128xf32>
    %342 = vector.broadcast %11 : f32 to vector<8x128xf32>
    %343 = arith.mulf %342, %174 : vector<8x128xf32>
    %344 = arith.addf %341, %343 : vector<8x128xf32>
    %345 = vector.broadcast %12 : f32 to vector<8x128xf32>
    %346 = arith.mulf %345, %253 : vector<8x128xf32>
    %347 = arith.addf %344, %346 : vector<8x128xf32>
    %348 = vector.broadcast %13 : f32 to vector<8x128xf32>
    %349 = arith.mulf %348, %95 : vector<8x128xf32>
    %350 = vector.broadcast %14 : f32 to vector<8x128xf32>
    %351 = arith.mulf %350, %174 : vector<8x128xf32>
    %352 = arith.addf %349, %351 : vector<8x128xf32>
    %353 = vector.broadcast %15 : f32 to vector<8x128xf32>
    %354 = arith.mulf %353, %253 : vector<8x128xf32>
    %355 = arith.addf %352, %354 : vector<8x128xf32>
    %356 = vector.broadcast %16 : f32 to vector<8x128xf32>
    %357 = arith.mulf %356, %332 : vector<8x128xf32>
    %358 = arith.addf %355, %357 : vector<8x128xf32>
    %359 = vector.broadcast %0 : f32 to vector<8x128xf32>
    %360 = arith.addf %359, %334 : vector<8x128xf32>
    %361 = vector.broadcast %1 : f32 to vector<8x128xf32>
    %362 = arith.addf %361, %339 : vector<8x128xf32>
    %363 = arith.subf %360, %362 : vector<8x128xf32>
    %364 = vector.broadcast %6 : f32 to vector<8x128xf32>
    %365 = arith.addf %363, %364 : vector<8x128xf32>
    %cst_127 = arith.constant 0.000000e+00 : f32
    %366 = vector.broadcast %cst_127 : f32 to vector<8x128xf32>
    %367 = arith.cmpf oge, %365, %366 : vector<8x128xf32>
    %cst_128 = arith.constant 1.000000e+00 : f32
    %cst_129 = arith.constant 0.000000e+00 : f32
    %368 = vector.broadcast %cst_128 : f32 to vector<8x128xf32>
    %369 = vector.broadcast %cst_129 : f32 to vector<8x128xf32>
    %370 = arith.select %367, %368, %369 : vector<8x128xi1>, vector<8x128xf32>
    %371 = vector.broadcast %0 : f32 to vector<8x128xf32>
    %372 = arith.addf %371, %347 : vector<8x128xf32>
    %373 = vector.broadcast %2 : f32 to vector<8x128xf32>
    %374 = arith.mulf %373, %370 : vector<8x128xf32>
    %375 = arith.addf %372, %374 : vector<8x128xf32>
    %376 = arith.addf %1, %3 : f32
    %377 = vector.broadcast %376 : f32 to vector<8x128xf32>
    %378 = arith.addf %377, %358 : vector<8x128xf32>
    %379 = vector.broadcast %3 : f32 to vector<8x128xf32>
    %380 = arith.mulf %379, %370 : vector<8x128xf32>
    %381 = arith.subf %378, %380 : vector<8x128xf32>
    %382 = arith.subf %375, %381 : vector<8x128xf32>
    %cst_130 = arith.constant 0.000000e+00 : f32
    %383 = vector.broadcast %cst_130 : f32 to vector<8x128xf32>
    %384 = arith.cmpf oge, %382, %383 : vector<8x128xf32>
    %cst_131 = arith.constant 1.000000e+00 : f32
    %cst_132 = arith.constant 0.000000e+00 : f32
    %385 = vector.broadcast %cst_131 : f32 to vector<8x128xf32>
    %386 = vector.broadcast %cst_132 : f32 to vector<8x128xf32>
    %387 = arith.select %384, %385, %386 : vector<8x128xi1>, vector<8x128xf32>
    %388 = arith.subf %360, %362 : vector<8x128xf32>
    %389 = arith.mulf %370, %388 : vector<8x128xf32>
    %390 = arith.addf %362, %389 : vector<8x128xf32>
    %391 = arith.subf %375, %381 : vector<8x128xf32>
    %392 = arith.mulf %387, %391 : vector<8x128xf32>
    %393 = arith.addf %381, %392 : vector<8x128xf32>
    %c0_133 = arith.constant 0 : index
    %c0_134 = arith.constant 0 : index
    %c0_135 = arith.constant 0 : index
    %394 = vector.load %arg3[%c0_133, %c0_134, %c0_135] : memref<4x8x128xf32, #tpu.memory_space<vmem>>, vector<1x8x128xf32>
    %395 = vector.shape_cast %394 : vector<1x8x128xf32> to vector<8x128xf32>
    %396 = vector.shape_cast %390 : vector<8x128xf32> to vector<1x8x128xf32>
    tpu.vector_store %arg3[%c0_133, %c0_134, %c0_135], %396 {strides = array<i32>} : memref<4x8x128xf32, #tpu.memory_space<vmem>>, vector<1x8x128xf32>,
    %c1_136 = arith.constant 1 : index
    %c0_137 = arith.constant 0 : index
    %c0_138 = arith.constant 0 : index
    %397 = vector.load %arg3[%c1_136, %c0_137, %c0_138] : memref<4x8x128xf32, #tpu.memory_space<vmem>>, vector<1x8x128xf32>
    %398 = vector.shape_cast %397 : vector<1x8x128xf32> to vector<8x128xf32>
    %399 = vector.shape_cast %393 : vector<8x128xf32> to vector<1x8x128xf32>
    tpu.vector_store %arg3[%c1_136, %c0_137, %c0_138], %399 {strides = array<i32>} : memref<4x8x128xf32, #tpu.memory_space<vmem>>, vector<1x8x128xf32>,
    %c2_139 = arith.constant 2 : index
    %c0_140 = arith.constant 0 : index
    %c0_141 = arith.constant 0 : index
    %400 = vector.load %arg3[%c2_139, %c0_140, %c0_141] : memref<4x8x128xf32, #tpu.memory_space<vmem>>, vector<1x8x128xf32>
    %401 = vector.shape_cast %400 : vector<1x8x128xf32> to vector<8x128xf32>
    %402 = vector.shape_cast %370 : vector<8x128xf32> to vector<1x8x128xf32>
    tpu.vector_store %arg3[%c2_139, %c0_140, %c0_141], %402 {strides = array<i32>} : memref<4x8x128xf32, #tpu.memory_space<vmem>>, vector<1x8x128xf32>,
    %c3_142 = arith.constant 3 : index
    %c0_143 = arith.constant 0 : index
    %c0_144 = arith.constant 0 : index
    %403 = vector.load %arg3[%c3_142, %c0_143, %c0_144] : memref<4x8x128xf32, #tpu.memory_space<vmem>>, vector<1x8x128xf32>
    %404 = vector.shape_cast %403 : vector<1x8x128xf32> to vector<8x128xf32>
    %405 = vector.shape_cast %387 : vector<8x128xf32> to vector<1x8x128xf32>
    tpu.vector_store %arg3[%c3_142, %c0_143, %c0_144], %405 {strides = array<i32>} : memref<4x8x128xf32, #tpu.memory_space<vmem>>, vector<1x8x128xf32>,
    return
  }
  func.func @transform_0(%arg0: i32) -> i32 {
    %c0_i32 = arith.constant 0 : i32
    %c0_i32_0 = arith.constant 0 : i32
    return %c0_i32 : i32
  }
  func.func @transform_1(%arg0: i32) -> (i32, i32, i32) {
    %c0_i32 = arith.constant 0 : i32
    %c0_i32_0 = arith.constant 0 : i32
    %c0_i32_1 = arith.constant 0 : i32
    return %c0_i32, %arg0, %c0_i32_0 : i32, i32, i32
  }
  func.func @transform_2(%arg0: i32) -> (i32, i32, i32) {
    %c0_i32 = arith.constant 0 : i32
    %c0_i32_0 = arith.constant 0 : i32
    %c0_i32_1 = arith.constant 0 : i32
    return %c0_i32, %arg0, %c0_i32_0 : i32, i32, i32
  }
}

</mosaic_0001>

<bundles_post_ra>
// kernel: custom-call.2
= control target key start
LH: loop header
LB: loop body
LE: loop exit
PB: predicated region body
PF: predicated region fallthrough
CT: control target
= control target key end

     0   :  { %v176_v0 = vmov 0.0   ;;  %vm38_vm0 = vcmask 7168   ;;  %vm56_vm1 = vcmask 15368   ;;  %vm73_vm2 = vcmask 1047553   ;;  %s193_s0 = inlined_call_operand.vmem [shape: f32[4,4], index: 0, kind: input, shape index: {}]   ;;  %s194_s1 = inlined_call_operand.vmem [shape: f32[4,4], index: 1, kind: output, shape index: {}]  }
   0x1   :  { %37 = vst [vmem:[#allocation2] sm:$0xff] %v176_v0  ;;  %v17_v2 = vld [vmem:[%s193_s0] sm:$0xf]  ;;  %vm74_vm3 = vmand %vm56_vm1, %vm73_vm2  ;;  %vm78_vm4 = vcmask 23568   ;;  %vm95_vm5 = vcmask 1047554   ;;  %vm100_vm7 = vcmask 31768  }
   0x2   :  { %18 = vst [vmem:[#allocation1] sm:$0xf] %v17_v2  ;;  %vm96_vm6 = vmand %vm78_vm4, %vm95_vm5  ;;  %vm117_vm8 = vcmask 1047555  }
   0x3   :  { %vm118_vm9 = vmand %vm100_vm7, %vm117_vm8 }
   0x8   :  { %v39_v1 = vld [vmem:[#allocation2] ss:$0 sm:$0xff] }
   0x9   :  { %v41_v3 = vmul.f32 %v39_v1, %v39_v1  ;;  %v48_v4 = vmul.f32 0.0, %v39_v1  ;;  %v35_v5 = vld [vmem:[#allocation1] sm:$0xf] }
   0xa   :  { %36 = vst [vmem:[#allocation0] sm:$0xf] %v35_v5 }
   0xb   :  { %42 = vadd.xlane.f32.xlu0 %v41_v3 }
   0xf   :  { %49 = vadd.xlane.f32.xlu0 %v48_v4 }
  0x11   :  { %v40_v6 = vld [vmem:[#allocation0] ss:$0 sm:$0xff]  ;;  %v60_v18 = vld [vmem:[#allocation0 + $0x1] ss:$0 sm:$0xff]  ;;  %v82_v30 = vld [vmem:[#allocation0 + $0x2] ss:$0 sm:$0xff] }
  0x12   :  { %v46_v10 = vld [vmem:[#allocation0] sm:$0xff] }
  0x13   :  { %v104_v42 = vld [vmem:[#allocation0 + $0x3] ss:$0 sm:$0xff] }
  0x98   :  { %v43_v7 = vpop.xlane.xlu0 %42 }
  0x99   :  { %v44_v8 = vsub.f32 %v40_v6, %v43_v7 }
  0x9b   :  { %168 = vrsqrt.f32 %v44_v8 }
  0x9c   :  { %v50_v9 = vpop.xlane.xlu0 %49 }
  0x9d   :  { %v51_v11 = vsub.f32 %v46_v10, %v50_v9 }
  0xa5   :  { %v169_v12 = vpop.eup %168 }
  0xa6   :  { %v52_v13 = vmul.f32 %v169_v12, %v51_v11 }
  0xa8   :  { %v53_v14 = vsel %vm38_vm0, %v52_v13, 0.0 }
  0xa9   :  { %55 = vst [vmem:[#allocation2] sm:$0xff] %v53_v14 }
  0xb0   :  { %v58_v15 = vld [vmem:[#allocation2 + $0x1] ss:$0 sm:$0xff] }
  0xb1   :  { %v61_v16 = vmul.f32 %v58_v15, %v58_v15  ;;  %v68_v17 = vmul.f32 %v58_v15, %v53_v14 }
  0xb3   :  { %62 = vadd.xlane.f32.xlu1 %v61_v16 }
  0xb7   :  { %69 = vadd.xlane.f32.xlu1 %v68_v17 }
 0x140   :  { %v63_v19 = vpop.xlane.xlu1 %62 }
 0x141   :  { %v64_v20 = vsub.f32 %v60_v18, %v63_v19 }
 0x143   :  { %170 = vrsqrt.f32 %v64_v20 }
 0x144   :  { %v70_v21 = vpop.xlane.xlu1 %69 }
 0x145   :  { %v71_v22 = vsub.f32 %v46_v10, %v70_v21 }
 0x14d   :  { %v171_v23 = vpop.eup %170 }
 0x14e   :  { %v72_v24 = vmul.f32 %v171_v23, %v71_v22 }
 0x150   :  { %v75_v25 = vsel %vm74_vm3, %v72_v24, 0.0 }
 0x151   :  { %v76_v26 = vadd.f32 %v75_v25, %v53_v14 }
 0x153   :  { %77 = vst [vmem:[#allocation2] sm:$0xff] %v76_v26 }
 0x15a   :  { %v80_v27 = vld [vmem:[#allocation2 + $0x2] ss:$0 sm:$0xff] }
 0x15b   :  { %v90_v28 = vmul.f32 %v80_v27, %v76_v26  ;;  %v83_v29 = vmul.f32 %v80_v27, %v80_v27 }
 0x15d   :  { %91 = vadd.xlane.f32.xlu1 %v90_v28  ;;  %84 = vadd.xlane.f32.xlu0 %v83_v29 }
 0x1ea   :  { %v85_v31 = vpop.xlane.xlu0 %84  ;;  %v92_v33 = vpop.xlane.xlu1 %91 }
 0x1eb   :  { %v86_v32 = vsub.f32 %v82_v30, %v85_v31  ;;  %v93_v34 = vsub.f32 %v46_v10, %v92_v33 }
 0x1ed   :  { %172 = vrsqrt.f32 %v86_v32 }
 0x1f7   :  { %v173_v35 = vpop.eup %172 }
 0x1f8   :  { %v94_v36 = vmul.f32 %v173_v35, %v93_v34 }
 0x1fa   :  { %v97_v37 = vsel %vm96_vm6, %v94_v36, 0.0 }
 0x1fb   :  { %v98_v38 = vadd.f32 %v97_v37, %v76_v26 }
 0x1fd   :  { %99 = vst [vmem:[#allocation2] sm:$0xff] %v98_v38 }
 0x204   :  { %v102_v39 = vld [vmem:[#allocation2 + $0x3] ss:$0 sm:$0xff] }
 0x205   :  { %v112_v40 = vmul.f32 %v102_v39, %v98_v38  ;;  %v105_v41 = vmul.f32 %v102_v39, %v102_v39 }
 0x207   :  { %113 = vadd.xlane.f32.xlu1 %v112_v40  ;;  %106 = vadd.xlane.f32.xlu0 %v105_v41 }
 0x294   :  { %v107_v43 = vpop.xlane.xlu0 %106  ;;  %v114_v45 = vpop.xlane.xlu1 %113 }
 0x295   :  { %v108_v44 = vsub.f32 %v104_v42, %v107_v43  ;;  %v115_v46 = vsub.f32 %v46_v10, %v114_v45 }
 0x297   :  { %174 = vrsqrt.f32 %v108_v44 }
 0x2a1   :  { %v175_v47 = vpop.eup %174 }
 0x2a2   :  { %v116_v48 = vmul.f32 %v175_v47, %v115_v46 }
 0x2a4   :  { %v119_v49 = vsel %vm118_vm9, %v116_v48, 0.0 }
 0x2a5   :  { %v120_v50 = vadd.f32 %v119_v49, %v98_v38 }
 0x2a7   :  { %121 = vst [vmem:[#allocation2] sm:$0xff] %v120_v50 }
 0x2ae   :  { %v125_v51 = vld [vmem:[#allocation2] sm:$0xf] }
 0x2af   :  { %127 = vst [vmem:[#allocation3] sm:$0xf] %v125_v51 }
 0x2b6   :  { %v143_v52 = vld [vmem:[#allocation3] sm:$0xf] }
 0x2b7   :  { %144 = vst [vmem:[%s194_s1] sm:$0xf] %v143_v52 }

// kernel: royinv.1
= control target key start
LH: loop header
LB: loop body
LE: loop exit
PB: predicated region body
PF: predicated region fallthrough
CT: control target
= control target key end

     0   :  { %7 = vsyncpa [#allocation3], 0  ;;  %s782_s9 = smov 0   ;;  %s784_s10 = smov 0   ;;  %s1080_s0 = inlined_call_operand.vmem [shape: f32[16], index: 0, kind: input, shape index: {}]   ;;  %s1081_s1 = inlined_call_operand.vmem [shape: f32[4,32,128], index: 1, kind: input, shape index: {}]   ;;  %s1082_s2 = inlined_call_operand.vmem [shape: f32[4,32,128], index: 2, kind: output, shape index: {}]  }
   0x1   :  { %s786_s11 = smov 0  }
   0x2 LB: > { %s798_s12 = sadd.s32 4294967295, %s763_s11   ;;  %s801_s13 = sadd.s32 1, %s763_s11   ;;  %s763_s11 = sphi %s786_s11, %s1089_s11   ;;  %s759_s10 = sphi %s784_s10, %s1088_s10   ;;  %s755_s9 = sphi %s782_s9, %s1087_s9  }
   0x3   : > { %s38_s14 = ssub.s32 %s763_s11, %s801_s13  ;;  %s41_s15 = sadd.s32 1, %s759_s10 }
   0x4   : > { %p39_p0 = scmp.eq.s32.totalorder %s38_s14, 0  ;;  %p48_p1 = scmp.ne.s32.totalorder %s759_s10, %s755_s9 }
   0x5   : > { %p49_p2 = scmp.eq.s32.totalorder %s763_s11, 0  ;;  %p78_p3 = scmp.eq.s32.totalorder %s798_s12, 3 }
   0x6   : > { %s811_s16 = scalar_select %p39_p0, %s759_s10, %s41_s15  }
   0x7   : > { %p813_p4 = por %p49_p2, %p48_p1  ;;  %p817_p5 = por %p78_p3, %p48_p1 }
   0x8   : > { %p624_p6 = scmp.ge.s32.totalorder %s763_s11, 1  ;;  %p91_p7 = scmp.lt.s32.totalorder %s763_s11, 5 }
   0x9   : > { %s1084_s18 = scalar_select %p817_p5, 1, 0 }
   0xa   : > { %p678_p8 = scmp.eq.s32.totalorder %s798_s12, 0  ;;  %p824_p9 = pnand %p624_p6, %p91_p7 }
   0xb   : > { %s104_s22 = sshll.u32 %s1080_s0, 4  ;;  %s105_s22 = int_to_ptr.vmem [resolvable:$true] %s104_s22 }
   0xc   : > { %p674_p10 = pneg %p824_p9  ;;  %s722_s23 = scalar_lea.vmem %s105_s22, 16 }
   0xd   : > { %p723_p12 = scmp.ne.s32.totalorder %s105_s22, %s722_s23  ;;  %p730_p2 = scmp.lt.s32.totalorder %s105_s22, %s105_s22 }
   0xe   : > { %p675_p11 = pnand %p678_p8, %p674_p10  ;;  %p731_p3 = scmp.lt.s32.totalorder %s722_s23, %s722_s23 }
  0x10   : > { %p724_p13 = pneg %p675_p11  ;;  %p732_p6 = por %p731_p3, %p730_p2 }
  0x12   : > { %p725_p0 = pnand %p724_p13, %p723_p12 }
  0x14   : > { %p726_p1 = pneg %p725_p0 }
  0x16   : > { %p733_p7 = pnand %p732_p6, %p726_p1 }
  0x18   : > { %736 = shalt.err (!%p733_p7)
}
  0x19   : > { %s765_s24 = smov [#allocation2]   ;;  %p626_p5 = scmp.ge.s32.totalorder %s763_s11, 4 }
  0x1a   : > { %677 = dma.vmem_to_smem (!%p675_p11), %s105_s22, 16, %s765_s24, [#allocation3]  }
  0x1b   : > { %111 = sbr.rel (%p626_p5) target bundleno = 42 (0x2a), region = 20 }
  0x22   : > { %114 = sbr.rel (!%p813_p4) target bundleno = 42 (0x2a), region = 24  ;;  %s116_s25 = sand.u32 (%p813_p4), 1, %s759_s10  }
  0x23   : > { %s628_s26 = sshll.u32 (%p813_p4), %s763_s11, 3  ;;  %s627_s27 = sshll.u32 (%p813_p4), %s116_s25, 5 }
  0x24   : > { %s120_s30 = scalar_lea.vmem (%p813_p4), %s1081_s1, %s628_s26  ;;  %s118_s3 = scalar_lea.vmem (%p813_p4), [#allocation4], %s627_s27 }
  0x25   : > { %v154_v0 = vld [vmem:[%s120_s30] sm:$0xff] (%p813_p4) }
  0x26   : > { %v156_v1 = vld [vmem:[%s120_s30 + $0x20] sm:$0xff] (%p813_p4)  ;;  %155 = vst [vmem:[%s118_s3] sm:$0xff] (%p813_p4), %v154_v0 }
  0x27   : > { %v158_v2 = vld [vmem:[%s120_s30 + $0x40] sm:$0xff] (%p813_p4)  ;;  %157 = vst [vmem:[%s118_s3 + $0x8] sm:$0xff] (%p813_p4), %v156_v1 }
  0x28   : > { %159 = vst [vmem:[%s118_s3 + $0x10] sm:$0xff] (%p813_p4), %v158_v2  ;;  %v160_v3 = vld [vmem:[%s120_s30 + $0x60] sm:$0xff] (%p813_p4) }
  0x29   : > { %161 = vst [vmem:[%s118_s3 + $0x18] sm:$0xff] %v160_v3 }
  0x2a PF: > { %170 = sbr.rel (%p824_p9) target bundleno = 171 (0xab), region = 62 }
  0x31   : > { %750 = dma.done.wait (%p678_p8), [#allocation3], 16  }
  0x32   : > { %752 = vsyncadd (%p678_p8), [#allocation3], 4294967280  ;;  %s177_s4 = sand.u32 1, %s755_s9  }
  0x33   : > { %s850_s5 = sshll.u32 %s177_s4, 5 }
  0x34   : > { %s179_s6 = scalar_lea.vmem [#allocation4], %s850_s5 }
  0x35   : > { %183 = sfence }
  0x36   : > { %v215_v4 = vld [vmem:[%s179_s6] sm:$0xff]  ;;  %v651_v5 = vld [vmem:[%s179_s6 + $0x8] sm:$0xff]  ;;  %v655_v11 = vld [vmem:[%s179_s6 + $0x10] sm:$0xff]  ;;  %s965_s7 = sld [smem:[#allocation2]]  ;;  %s970_s8 = sld [smem:[#allocation2 + $0x6]] }
  0x37   : > { %v216_v6 = vmax.f32 %v215_v4, 1e-06  ;;  %v273_v7 = vmax.f32 %v651_v5, 1e-06  ;;  %v659_v13 = vld [vmem:[%s179_s6 + $0x18] sm:$0xff]  ;;  %s976_s9 = sld [smem:[#allocation2 + $0x7]] }
  0x38   : > { %v330_v16 = vmax.f32 %v655_v11, 1e-06  ;;  %v387_v19 = vmax.f32 %v659_v13, 1e-06  ;;  %s979_s11 = sld [smem:[#allocation2 + $0x8]]  ;;  %s981_s14 = sld [smem:[#allocation2 + $0x9]] }
  0x39   : > { %v217_v8 = vmin.f32 %v216_v6, 0.999999  ;;  %v274_v9 = vmin.f32 %v273_v7, 0.999999  ;;  %s987_s15 = sld [smem:[#allocation2 + $0xa]]  ;;  %s989_s17 = sld [smem:[#allocation2 + $0xc]] }
  0x3a   : > { %v331_v22 = vmin.f32 %v330_v16, 0.999999  ;;  %v388_v24 = vmin.f32 %v387_v19, 0.999999  ;;  %s997_s19 = sld [smem:[#allocation2 + $0xd]]  ;;  %s1006_s20 = sld [smem:[#allocation2 + $0x1]] }
  0x3b   : > { %v218_v10 = vmul.f32 2.0, %v217_v8  ;;  %v275_v12 = vmul.f32 2.0, %v274_v9  ;;  %s1008_s21 = sld [smem:[#allocation2 + $0x4]]  ;;  %s1015_s22 = sld [smem:[#allocation2 + $0x5]] }
  0x3c   : > { %v332_v26 = vmul.f32 2.0, %v331_v22  ;;  %v389_v27 = vmul.f32 2.0, %v388_v24  ;;  %s1022_s23 = sld [smem:[#allocation2 + $0xb]]  ;;  %s1024_s24 = sld [smem:[#allocation2 + $0xe]] }
  0x3d   : > { %v853_v14 = vadd.f32 -1.0, %v218_v10  ;;  %v855_v15 = vadd.f32 -1.0, %v275_v12  ;;  %s1036_s25 = sld [smem:[#allocation2 + $0x2]]  ;;  %s1042_s27 = sld [smem:[#allocation2 + $0x3]] }
  0x3e   : > { %v861_v28 = vadd.f32 -1.0, %v332_v26  ;;  %v863_v29 = vadd.f32 -1.0, %v389_v27  ;;  %s1044_s28 = sld [smem:[#allocation2 + $0xf]]  ;;  %s197_s30 = scalar_lea.vmem [#allocation5], %s850_s5 }
  0x3f   : > { %v220_v17 = vsub.f32 1.0, %v853_v14  ;;  %v221_v18 = vadd.f32 1.0, %v853_v14  ;;  %v277_v20 = vsub.f32 1.0, %v855_v15  ;;  %v278_v21 = vadd.f32 1.0, %v855_v15  ;;  %p1086_p4 = scmp.ne.s32.totalorder %s1084_s18, 0 }
  0x40   : > { %v334_v30 = vsub.f32 1.0, %v861_v28  ;;  %v335_v31 = vadd.f32 1.0, %v861_v28  ;;  %v391_v32 = vsub.f32 1.0, %v863_v29  ;;  %v392_v33 = vadd.f32 1.0, %v863_v29  ;;  %s667_s3 = sshll.u32 (%p1086_p4), %s798_s12, 3 }
  0x41   : > { %v222_v23 = vmul.f32 %v221_v18, %v220_v17  ;;  %v279_v25 = vmul.f32 %v278_v21, %v277_v20  ;;  %s204_s26 = ssub.f32 %s1008_s21, %s1015_s22  ;;  %s509_s6 = scalar_lea.vmem (%p1086_p4), %s1082_s2, %s667_s3 }
  0x42   : > { %v336_v34 = vmul.f32 %v335_v31, %v334_v30  ;;  %v393_v35 = vmul.f32 %v392_v33, %v391_v32 }
  0x43   : > { %706 = vlog2.f32 %v222_v23  ;;  %s481_s29 = sadd.f32 %s1042_s27, %s1006_s20 }
  0x44   : > { %708 = vlog2.f32 %v279_v25 }
  0x45   : > { %710 = vlog2.f32 %v336_v34 }
  0x46   : > { %712 = vlog2.f32 %v393_v35 }
  0x4d   : > { %v707_v36 = vpop.eup %706 }
  0x4e   : > { %v709_v37 = vpop.eup %708  ;;  %v224_v38 = vmul.f32 0.6931472, %v707_v36 }
  0x4f   : > { %v281_v39 = vmul.f32 0.6931472, %v709_v37  ;;  %v711_v44 = vpop.eup %710 }
  0x50   : > { %v869_v40 = vsub.f32 0.0, %v224_v38  ;;  %v713_v46 = vpop.eup %712  ;;  %v338_v48 = vmul.f32 0.6931472, %v711_v44 }
  0x51   : > { %v871_v41 = vsub.f32 0.0, %v281_v39  ;;  %v395_v50 = vmul.f32 0.6931472, %v713_v46 }
  0x52   : > { %v874_v42 = vadd.f32 -2.5, %v869_v40  ;;  %714 = vrsqrt.f32 %v869_v40  ;;  %v883_v52 = vsub.f32 0.0, %v338_v48  ;;  %vm245_vm0 = vcmp.eq.f32.partialorder %v869_v40, inf }
  0x53   : > { %v878_v43 = vadd.f32 -2.5, %v871_v41  ;;  %716 = vrsqrt.f32 %v871_v41  ;;  %v886_v54 = vsub.f32 0.0, %v395_v50  ;;  %vm247_vm1 = vcmp.eq.f32.partialorder %v869_v40, 0.0 }
  0x54   : > { %v227_v45 = vmul.f32 2.8102264e-08, %v874_v42  ;;  %v890_v56 = vadd.f32 -2.5, %v883_v52  ;;  %718 = vrsqrt.f32 %v883_v52  ;;  %v248_v58 = vand.u32 2147483648, %v869_v40 }
  0x55   : > { %v284_v47 = vmul.f32 2.8102264e-08, %v878_v43  ;;  %v898_v61 = vadd.f32 -2.5, %v886_v54  ;;  %vm302_vm2 = vcmp.eq.f32.partialorder %v871_v41, inf  ;;  %v305_v0 = vand.u32 2147483648, %v871_v41 }
  0x56   : > { %v228_v49 = vadd.f32 3.4327394e-07, %v227_v45  ;;  %v341_v60 = vmul.f32 2.8102264e-08, %v890_v56  ;;  %720 = vrsqrt.f32 %v886_v54  ;;  %vm304_vm3 = vcmp.eq.f32.partialorder %v871_v41, 0.0 }
  0x57   : > { %v285_v51 = vadd.f32 3.4327394e-07, %v284_v47  ;;  %v398_v5 = vmul.f32 2.8102264e-08, %v898_v61  ;;  %vm359_vm4 = vcmp.eq.f32.partialorder %v883_v52, inf  ;;  %vm361_vm5 = vcmp.eq.f32.partialorder %v883_v52, 0.0 }
  0x58   : > { %v229_v53 = vmul.f32 %v874_v42, %v228_v49  ;;  %v342_v4 = vadd.f32 3.4327394e-07, %v341_v60  ;;  %v362_v30 = vand.u32 2147483648, %v883_v52  ;;  %vm416_vm6 = vcmp.eq.f32.partialorder %v886_v54, inf }
  0x59   : > { %v286_v55 = vmul.f32 %v878_v43, %v285_v51  ;;  %v399_v11 = vadd.f32 3.4327394e-07, %v398_v5  ;;  %v419_v60 = vand.u32 2147483648, %v886_v54  ;;  %vm418_vm7 = vcmp.eq.f32.partialorder %v886_v54, 0.0 }
  0x5a   : > { %v230_v57 = vadd.f32 -3.5233877e-06, %v229_v53  ;;  %v343_v10 = vmul.f32 %v890_v56, %v342_v4  ;;  %vm268_vm8 = vcmp.lt.f32.partialorder %v869_v40, 5.0  ;;  %vm325_vm9 = vcmp.lt.f32.partialorder %v871_v41, 5.0 }
  0x5b   : > { %v287_v59 = vadd.f32 -3.5233877e-06, %v286_v55  ;;  %v400_v23 = vmul.f32 %v898_v61, %v399_v11  ;;  %vm382_vm10 = vcmp.lt.f32.partialorder %v883_v52, 5.0  ;;  %vm439_vm11 = vcmp.lt.f32.partialorder %v886_v54, 5.0 }
  0x5c   : > { %v715_v62 = vpop.eup %714  ;;  %v231_v63 = vmul.f32 %v874_v42, %v230_v57  ;;  %v344_v20 = vadd.f32 -3.5233877e-06, %v343_v10 }
  0x5d   : > { %v717_v1 = vpop.eup %716  ;;  %v244_v2 = vmul.f32 %v715_v62, %v869_v40  ;;  %v288_v3 = vmul.f32 %v878_v43, %v287_v59  ;;  %v401_v34 = vadd.f32 -3.5233877e-06, %v400_v23 }
  0x5e   : > { %v232_v6 = vadd.f32 -4.3915065e-06, %v231_v63  ;;  %v301_v7 = vmul.f32 %v717_v1, %v871_v41  ;;  %v719_v24 = vpop.eup %718  ;;  %v345_v27 = vmul.f32 %v890_v56, %v344_v20 }
  0x5f   : > { %v246_v8 = vsel %vm245_vm0, %v869_v40, %v244_v2  ;;  %v289_v9 = vadd.f32 -4.3915065e-06, %v288_v3  ;;  %v358_v33 = vmul.f32 %v719_v24, %v883_v52  ;;  %v402_v45 = vmul.f32 %v898_v61, %v401_v34 }
  0x60   : > { %v233_v12 = vmul.f32 %v874_v42, %v232_v6  ;;  %v249_v13 = vsel %vm247_vm1, %v248_v58, %v246_v8  ;;  %v303_v16 = vsel %vm302_vm2, %v871_v41, %v301_v7  ;;  %v346_v37 = vadd.f32 -4.3915065e-06, %v345_v27  ;;  %v721_v38 = vpop.eup %720 }
  0x61   : > { %v920_v17 = vadd.f32 -3.0, %v249_v13  ;;  %v290_v18 = vmul.f32 %v878_v43, %v289_v9  ;;  %v306_v19 = vsel %vm304_vm3, %v305_v0, %v303_v16  ;;  %v360_v44 = vsel %vm359_vm4, %v883_v52, %v358_v33 }
  0x62   : > { %v234_v21 = vadd.f32 0.00021858087, %v233_v12  ;;  %v923_v22 = vadd.f32 -3.0, %v306_v19  ;;  %v347_v48 = vmul.f32 %v890_v56, %v346_v37  ;;  %v363_v49 = vsel %vm361_vm5, %v362_v30, %v360_v44 }
  0x63   : > { %v251_v25 = vmul.f32 -0.00020021426, %v920_v17  ;;  %v291_v26 = vadd.f32 0.00021858087, %v290_v18  ;;  %v944_v53 = vadd.f32 -3.0, %v363_v49  ;;  %v415_v59 = vmul.f32 %v721_v38, %v886_v54 }
  0x64   : > { %v235_v31 = vmul.f32 %v874_v42, %v234_v21  ;;  %v308_v32 = vmul.f32 -0.00020021426, %v923_v22  ;;  %v403_v55 = vadd.f32 -4.3915065e-06, %v402_v45  ;;  %v348_v58 = vadd.f32 0.00021858087, %v347_v48 }
  0x65   : > { %v252_v35 = vadd.f32 0.00010095056, %v251_v25  ;;  %v292_v36 = vmul.f32 %v878_v43, %v291_v26  ;;  %v365_v63 = vmul.f32 -0.00020021426, %v944_v53  ;;  %v417_v4 = vsel %vm416_vm6, %v886_v54, %v415_v59 }
  0x66   : > { %v309_v39 = vadd.f32 0.00010095056, %v308_v32  ;;  %v236_v46 = vadd.f32 -0.001253725, %v235_v31  ;;  %v404_v0 = vmul.f32 %v898_v61, %v403_v55  ;;  %v349_v3 = vmul.f32 %v890_v56, %v348_v58 }
  0x67   : > { %v253_v47 = vmul.f32 %v920_v17, %v252_v35  ;;  %v293_v50 = vadd.f32 -0.001253725, %v292_v36  ;;  %v366_v7 = vadd.f32 0.00010095056, %v365_v63  ;;  %v420_v11 = vsel %vm418_vm7, %v419_v60, %v417_v4 }
  0x68   : > { %v310_v51 = vmul.f32 %v923_v22, %v309_v39  ;;  %v237_v1 = vmul.f32 %v874_v42, %v236_v46  ;;  %v405_v8 = vadd.f32 0.00021858087, %v404_v0  ;;  %v350_v10 = vadd.f32 -0.001253725, %v349_v3 }
  0x69   : > { %v254_v57 = vadd.f32 0.0013493432, %v253_v47  ;;  %v294_v5 = vmul.f32 %v878_v43, %v293_v50  ;;  %v367_v13 = vmul.f32 %v944_v53, %v366_v7  ;;  %v961_v19 = vadd.f32 -3.0, %v420_v11 }
  0x6a   : > { %v311_v62 = vadd.f32 0.0013493432, %v310_v51  ;;  %v238_v16 = vadd.f32 -0.0041776816, %v237_v1  ;;  %v406_v24 = vmul.f32 %v898_v61, %v405_v8  ;;  %v351_v26 = vmul.f32 %v890_v56, %v350_v10 }
  0x6b   : > { %v255_v2 = vmul.f32 %v920_v17, %v254_v57  ;;  %v295_v20 = vadd.f32 -0.0041776816, %v294_v5  ;;  %v368_v23 = vadd.f32 0.0013493432, %v367_v13  ;;  %v422_v27 = vmul.f32 -0.00020021426, %v961_v19 }
  0x6c   : > { %v312_v6 = vmul.f32 %v923_v22, %v311_v62  ;;  %v239_v32 = vmul.f32 %v874_v42, %v238_v16  ;;  %v407_v38 = vadd.f32 -0.001253725, %v406_v24  ;;  %v352_v44 = vadd.f32 -0.0041776816, %v351_v26 }
  0x6d   : > { %v256_v9 = vadd.f32 -0.0036734284, %v255_v2  ;;  %v369_v31 = vmul.f32 %v944_v53, %v368_v23  ;;  %v423_v34 = vadd.f32 0.00010095056, %v422_v27  ;;  %v296_v35 = vmul.f32 %v878_v43, %v295_v20 }
  0x6e   : > { %v313_v12 = vadd.f32 -0.0036734284, %v312_v6  ;;  %v240_v48 = vadd.f32 0.24664073, %v239_v32  ;;  %v408_v58 = vmul.f32 %v898_v61, %v407_v38  ;;  %v353_v60 = vmul.f32 %v890_v56, %v352_v44 }
  0x6f   : > { %v257_v18 = vmul.f32 %v920_v17, %v256_v9  ;;  %v370_v37 = vadd.f32 -0.0036734284, %v369_v31  ;;  %v424_v45 = vmul.f32 %v961_v19, %v423_v34  ;;  %v297_v51 = vadd.f32 0.24664073, %v296_v35 }
  0x70   : > { %v314_v21 = vmul.f32 %v923_v22, %v313_v12  ;;  %v468_v63 = vstv %s965_s7  ;;  %v267_v0 = vmul.f32 1.4142135, %v853_v14  ;;  %v324_v2 = vmul.f32 1.4142135, %v855_v15 }
  0x71   : > { %v258_v25 = vadd.f32 0.0057395077, %v257_v18  ;;  %v371_v47 = vmul.f32 %v944_v53, %v370_v37  ;;  %v425_v50 = vadd.f32 0.0013493432, %v424_v45  ;;  %v241_v4 = vmul.f32 %v874_v42, %v240_v48 }
  0x72   : > { %v315_v30 = vadd.f32 0.0057395077, %v314_v21  ;;  %v442_v7 = vstv %s970_s8  ;;  %v298_v8 = vmul.f32 %v878_v43, %v297_v51  ;;  %v409_v10 = vadd.f32 -0.0041776816, %v408_v58 }
  0x73   : > { %v259_v33 = vmul.f32 %v920_v17, %v258_v25  ;;  %v372_v57 = vadd.f32 0.0057395077, %v371_v47  ;;  %v426_v62 = vmul.f32 %v961_v19, %v425_v50  ;;  %v354_v15 = vadd.f32 0.24664073, %v353_v60 }
  0x74   : > { %v316_v36 = vmul.f32 %v923_v22, %v315_v30  ;;  %v444_v13 = vstv %s976_s9  ;;  %v446_v18 = vstv %s979_s11  ;;  %v449_v20 = vstv %s981_s14 }
  0x75   : > { %v260_v39 = vadd.f32 -0.0076224613, %v259_v33  ;;  %v373_v3 = vmul.f32 %v944_v53, %v372_v57  ;;  %v427_v6 = vadd.f32 -0.0036734284, %v426_v62  ;;  %v242_v21 = vadd.f32 1.5014094, %v241_v4 }
  0x76   : > { %v317_v46 = vadd.f32 -0.0076224613, %v316_v36  ;;  %v299_v24 = vadd.f32 1.5014094, %v298_v8  ;;  %v410_v27 = vmul.f32 %v898_v61, %v409_v10  ;;  %v355_v31 = vmul.f32 %v890_v56, %v354_v15 }
  0x77   : > { %v261_v49 = vmul.f32 %v920_v17, %v260_v39  ;;  %v374_v9 = vadd.f32 -0.0076224613, %v373_v3  ;;  %v428_v12 = vmul.f32 %v961_v19, %v427_v6  ;;  %v451_v34 = vstv %s987_s15 }
  0x78   : > { %v318_v55 = vmul.f32 %v923_v22, %v317_v46  ;;  %v381_v36 = vmul.f32 1.4142135, %v861_v28  ;;  %v459_v41 = vstv %s997_s19  ;;  %v411_v44 = vadd.f32 0.24664073, %v410_v27 }
  0x79   : > { %v262_v59 = vadd.f32 0.0094388705, %v261_v49  ;;  %v375_v16 = vmul.f32 %v944_v53, %v374_v9  ;;  %v429_v23 = vadd.f32 0.0057395077, %v428_v12  ;;  %v356_v46 = vadd.f32 1.5014094, %v355_v31 }
  0x7a   : > { %v319_v1 = vadd.f32 0.0094388705, %v318_v55  ;;  %v470_v62 = vstv %s1006_s20  ;;  %v454_v4 = vstv %s1022_s23  ;;  %v462_v6 = vstv %s1024_s24 }
  0x7b   : > { %v263_v5 = vmul.f32 %v920_v17, %v262_v59  ;;  %v376_v26 = vadd.f32 0.0094388705, %v375_v16  ;;  %v412_v59 = vmul.f32 %v898_v61, %v411_v44  ;;  %v473_v9 = vstv %s204_s26 }
  0x7c   : > { %v320_v14 = vmul.f32 %v923_v22, %v319_v1  ;;  %v438_v52 = vmul.f32 1.4142135, %v863_v29  ;;  %v484_v29 = vstv %s1042_s27  ;;  %v482_v31 = vstv %s481_s29 }
  0x7d   : > { %v264_v11 = vadd.f32 1.001674, %v263_v5  ;;  %v377_v33 = vmul.f32 %v944_v53, %v376_v26 }
  0x7e   : > { %v321_v42 = vadd.f32 1.001674, %v320_v14  ;;  %v413_v14 = vadd.f32 1.5014094, %v412_v59 }
  0x7f   : > { %v265_v43 = vmul.f32 %v920_v17, %v264_v11  ;;  %v430_v17 = vmul.f32 %v961_v19, %v429_v23  ;;  %v378_v39 = vadd.f32 1.001674, %v377_v33 }
  0x80   : > { %v322_v25 = vmul.f32 %v923_v22, %v321_v42  ;;  %v457_v22 = vstv %s989_s17 }
  0x81   : > { %v266_v30 = vadd.f32 2.8329768, %v265_v43  ;;  %v431_v37 = vadd.f32 -0.0076224613, %v430_v17  ;;  %v379_v40 = vmul.f32 %v944_v53, %v378_v39  ;;  %v465_v43 = vstv %s1044_s28 }
  0x82   : > { %v323_v32 = vadd.f32 2.8329768, %v322_v25 }
  0x83   : > { %v269_v35 = vsel %vm268_vm8, %v242_v21, %v266_v30  ;;  %v432_v47 = vmul.f32 %v961_v19, %v431_v37  ;;  %v380_v58 = vadd.f32 2.8329768, %v379_v40 }
  0x84   : > { %v270_v38 = vmul.f32 %v269_v35, %v267_v0  ;;  %v326_v56 = vsel %vm325_vm9, %v299_v24, %v323_v32  ;;  %v766_v24 = vmov 0.0  }
  0x85   : > { %v327_v45 = vmul.f32 %v326_v56, %v324_v2  ;;  %v433_v50 = vadd.f32 0.0094388705, %v432_v47  ;;  %v383_v3 = vsel %vm382_vm10, %v356_v46, %v380_v58 }
  0x86   : > { %v443_v48 = vmul.f32 %v442_v7, %v270_v38  ;;  %v445_v49 = vmul.f32 %v444_v13, %v270_v38  ;;  %v450_v28 = vmul.f32 %v449_v20, %v270_v38  ;;  %v458_v57 = vmul.f32 %v457_v22, %v270_v38 }
  0x87   : > { %v447_v51 = vmul.f32 %v446_v18, %v327_v45  ;;  %v452_v55 = vmul.f32 %v451_v34, %v327_v45  ;;  %v460_v60 = vmul.f32 %v459_v41, %v327_v45  ;;  %v434_v53 = vmul.f32 %v961_v19, %v433_v50 }
  0x88   : > { %v469_v2 = vadd.f32 %v468_v63, %v443_v48  ;;  %v384_v61 = vmul.f32 %v383_v3, %v381_v36  ;;  %v478_v20 = vstv %s1036_s25 }
  0x89   : > { %v448_v0 = vadd.f32 %v447_v51, %v445_v49  ;;  %v453_v1 = vadd.f32 %v452_v55, %v450_v28  ;;  %v461_v5 = vadd.f32 %v460_v60, %v458_v57  ;;  %v435_v7 = vadd.f32 1.001674, %v434_v53 }
  0x8a   : > { %v455_v11 = vmul.f32 %v454_v4, %v384_v61  ;;  %v463_v15 = vmul.f32 %v462_v6, %v384_v61 }
  0x8b   : > { %v471_v8 = vadd.f32 %v470_v62, %v448_v0  ;;  %v436_v10 = vmul.f32 %v961_v19, %v435_v7 }
  0x8c   : > { %v456_v42 = vadd.f32 %v455_v11, %v453_v1  ;;  %v464_v16 = vadd.f32 %v463_v15, %v461_v5 }
  0x8d   : > { %v472_v12 = vsub.f32 %v469_v2, %v471_v8  ;;  %v437_v13 = vadd.f32 2.8329768, %v436_v10 }
  0x8e   : > { %v477_v23 = vadd.f32 %v468_v63, %v456_v42 }
  0x8f   : > { %v474_v18 = vadd.f32 %v473_v9, %v472_v12  ;;  %v440_v21 = vsel %vm439_vm11, %v413_v14, %v437_v13 }
  0x90   : > { %v441_v19 = vmul.f32 %v440_v21, %v438_v52 }
  0x91   : > { %vm475_vm12 = vcmp.ge.f32.partialorder %v474_v18, 0.0 }
  0x92   : > { %v476_v25 = vsel %vm475_vm12, 1.0, %v766_v24  ;;  %v466_v54 = vmul.f32 %v465_v43, %v441_v19 }
  0x93   : > { %v479_v26 = vmul.f32 %v478_v20, %v476_v25  ;;  %v490_v27 = vmul.f32 %v476_v25, %v472_v12  ;;  %664 = vst [vmem:[%s197_s30 + $0x10] sm:$0xff] %v476_v25  ;;  %v485_v33 = vmul.f32 %v484_v29, %v476_v25 }
  0x94   : > { %v467_v32 = vadd.f32 %v466_v54, %v464_v16 }
  0x95   : > { %v480_v30 = vadd.f32 %v479_v26, %v477_v23  ;;  %v491_v17 = vadd.f32 %v490_v27, %v471_v8 }
  0x96   : > { %v483_v34 = vadd.f32 %v482_v31, %v467_v32 }
  0x97   : > { %494 = vst [vmem:[%s197_s30] sm:$0xff] %v491_v17 }
  0x98   : > { %v486_v22 = vsub.f32 %v483_v34, %v485_v33 }
  0x9a   : > { %v487_v35 = vsub.f32 %v480_v30, %v486_v22  ;;  %v547_v56 = vld [vmem:[%s197_s30 + $0x10] sm:$0xff] (%p1086_p4) }
  0x9b   : > { %548 = vst [vmem:[%s509_s6 + $0x40] sm:$0xff] (%p1086_p4), %v547_v56 }
  0x9c   : > { %vm488_vm13 = vcmp.ge.f32.partialorder %v487_v35, 0.0  ;;  %507 = sbr.rel (!%p1086_p4) target bundleno = 171 (0xab), region = 74 }
  0x9d   : > { %v489_v63 = vsel %vm488_vm13, 1.0, %v766_v24 }
  0x9e   : > { %v492_v36 = vmul.f32 %v489_v63, %v487_v35  ;;  %665 = vst [vmem:[%s197_s30 + $0x18] sm:$0xff] %v489_v63  ;;  %v543_v41 = vld [vmem:[%s197_s30] sm:$0xff] (%p1086_p4) }
  0x9f   : > { %544 = vst [vmem:[%s509_s6] sm:$0xff] (%p1086_p4), %v543_v41 }
  0xa0   : > { %v493_v37 = vadd.f32 %v492_v36, %v486_v22 }
  0xa2   : > { %663 = vst [vmem:[%s197_s30 + $0x8] sm:$0xff] %v493_v37 }
  0xa5   : > { %v549_v39 = vld [vmem:[%s197_s30 + $0x18] sm:$0xff] }
  0xa6   : > { %550 = vst [vmem:[%s509_s6 + $0x60] sm:$0xff] %v549_v39 }
  0xa9   : > { %v545_v38 = vld [vmem:[%s197_s30 + $0x8] sm:$0xff] }
  0xaa   : > { %546 = vst [vmem:[%s509_s6 + $0x20] sm:$0xff] %v545_v38 }
  0xab PF: > { %p10_p5 = scmp.ge.s32.totalorder %s801_s13, 6   ;;  %s1087_s9 = smov %s759_s10 }
  0xac   : > { %s1088_s10 = smov %s811_s16  ;;  %s1089_s11 = smov %s801_s13 }
  0xad   :  { %12 = sbr.rel (!%p10_p5) target bundleno = 2 (0x2), region = 150 }
  0xb4   :  { %566 = vsyncpa [#allocation3], 1 }
  0xb5   :  { %568 = vsyncpa [#allocation3 + $0x1], 1 }

</bundles_post_ra>
